<compile_context>
chip_gen: v5e
topology: v5e:2x2
jax: 0.10.0
libtpu: 0.0.40
codegen_flags: <defaults>
</compile_context>

<pallas_src>
import functools

import jax
import jax.numpy as jnp
from jax import lax
from jax.experimental import pallas as pl
from jax.experimental.pallas import tpu as pltpu

LN_EPS = 1e-5


# --------------------------------------------------------------------------
# one-time parameter preprocessing (run once per model, NOT per forward call)
# --------------------------------------------------------------------------
def prepare_params(params):
    """Fuse QKV weights/biases, fold the attention scale, cast matrices to bf16."""
    C = params["wq"].shape[0]
    scale = jnp.float32(C ** -0.5)
    wqkv = jnp.concatenate(
        [params["wq"] * scale, params["wk"], params["wv"]], axis=1
    ).astype(jnp.bfloat16)                                        # (C, 3C)
    bqkv = jnp.concatenate(
        [params["bq"] * scale, params["bk"], params["bv"]], axis=1
    ).astype(jnp.float32)                                         # (1, 3C)
    return {
        "ln1_g": params["ln1_g"].astype(jnp.float32),
        "ln1_b": params["ln1_b"].astype(jnp.float32),
        "wqkv": wqkv,
        "bqkv": bqkv,
        "ln2_g": params["ln2_g"].astype(jnp.float32),
        "ln2_b": params["ln2_b"].astype(jnp.float32),
        "w1": params["w1"].astype(jnp.bfloat16),
        "b1": params["b1"].astype(jnp.float32),
    }


def _tensorcores_per_chip():
    """Best-effort TC count per chip; defaults to 1 (v5e/v6e behaviour)."""
    try:
        info = pltpu.get_tpu_info()
        for name in ("num_tensorcores", "tensorcores_per_chip", "num_cores"):
            n = getattr(info, name, None)
            if n:
                return int(n)
    except Exception:
        pass
    try:
        if "v7" in jax.devices()[0].device_kind.lower():
            return 2
    except Exception:
        pass
    return 1


def _default_batch_tile(B, T):
    # Split the batch over 2 grid steps only when (a) the chip has a second
    # TensorCore to run them on and (b) each half still gives the MXU >=256
    # LHS rows.  Otherwise a split just halves MXU fill and adds ~0.35us/step.
    if B % 2 == 0 and (B // 2) * T >= 256 and _tensorcores_per_chip() >= 2:
        return B // 2
    return B


# --------------------------------------------------------------------------
# kernel
# --------------------------------------------------------------------------
def transformer_block_kernel(
    x_ref,
    g1_ref, be1_ref,          # LayerNorm 1
    wqkv_ref, bqkv_ref,       # fused q/k/v projection (scale pre-folded)
    g2_ref, be2_ref,          # LayerNorm 2
    w1_ref, b1_ref,           # Linear 1
    o_ref,
    *, approx_recip,
):
    bt, T, C = x_ref.shape
    R = bt * T                # rows fed to the MXU per grid step

    x = x_ref[...].astype(jnp.float32).reshape(R, C)

    def layernorm(v, g, b):
        mu = jnp.mean(v, axis=-1, keepdims=True)
        xc = v - mu
        var = jnp.mean(xc * xc, axis=-1, keepdims=True)
        return xc * lax.rsqrt(var + LN_EPS) * g + b

    # ---------------- attention branch ----------------
    h = layernorm(x, g1_ref[...], be1_ref[...]).astype(jnp.bfloat16)

    # one fused MXU slab for q|k|v, one bias add, one bf16 cast
    qkv = (jnp.dot(h, wqkv_ref[...], preferred_element_type=jnp.float32)
           + bqkv_ref[...]).astype(jnp.bfloat16)                  # (R, 3C)
    q = qkv[:, 0 * C:1 * C].reshape(bt, T, C)   # already scaled by C**-0.5
    k = qkv[:, 1 * C:2 * C].reshape(bt, T, C)
    v = qkv[:, 2 * C:3 * C].reshape(bt, T, C)

    # contract last dims of q and k directly (no explicit k transpose);
    # the C**-0.5 scale was folded into Wq/bq at prep time.
    scores = jnp.einsum("bqc,bkc->bqk", q, k,
                        preferred_element_type=jnp.float32)        # (bt, T, T)

    row = lax.broadcasted_iota(jnp.int32, (T, T), 0)
    col = lax.broadcasted_iota(jnp.int32, (T, T), 1)
    causal = (row >= col)[None, :, :]
    scores = jnp.where(causal, scores, jnp.float32(-1e30))          # finite fill

    m = jnp.max(scores, axis=-1, keepdims=True)
    p = jnp.exp(scores - m)
    denom = jnp.sum(p, axis=-1, keepdims=True)
    if approx_recip:
        p = p * pl.reciprocal(denom, approx=True)                   # EUP slot
    else:
        p = p / denom

    attn = jnp.einsum("bqk,bkc->bqc", p.astype(jnp.bfloat16), v,
                      preferred_element_type=jnp.float32)
    x = x + attn.reshape(R, C)

    # ---------------- linear branch ----------------
    h2 = layernorm(x, g2_ref[...], be2_ref[...]).astype(jnp.bfloat16)
    y = x + jnp.dot(h2, w1_ref[...],
                    preferred_element_type=jnp.float32) + b1_ref[...]

    o_ref[...] = y.reshape(bt, T, C).astype(o_ref.dtype)


# --------------------------------------------------------------------------
# wrapper (zero per-call preprocessing: only the pallas_call itself)
# --------------------------------------------------------------------------
def transformer_block(x, prep, *, batch_tile=None, approx_recip=True):
    """x: (B, T, C) float32.  prep: output of prepare_params()."""
    B, T, C = x.shape

    if batch_tile is None:
        batch_tile = _default_batch_tile(B, T)
    assert B % batch_tile == 0
    steps = B // batch_tile

    x_spec = pl.BlockSpec((batch_tile, T, C), lambda i: (i, 0, 0))
    vec_spec = pl.BlockSpec((1, C), lambda i: (0, 0))
    qkv_vec_spec = pl.BlockSpec((1, 3 * C), lambda i: (0, 0))
    wqkv_spec = pl.BlockSpec((C, 3 * C), lambda i: (0, 0))
    w1_spec = pl.BlockSpec((C, C), lambda i: (0, 0))

    # cost estimate for the whole call (fused-QKV flops, real bytes moved)
    R_total = B * T
    flops = (2 * R_total * C * 3 * C       # fused qkv projection
             + 2 * B * T * T * C           # q @ k^T
             + 2 * B * T * T * C           # p @ v
             + 2 * R_total * C * C)        # final linear
    transcendentals = B * T * T + 2 * B * T
    bytes_accessed = (2 * B * T * C * 4    # activations in + out (f32)
                      + 4 * C * C * 2      # wqkv + w1 (bf16)
                      + 8 * C * 4)         # gains / biases (f32)

    # explicit VMEM budget (>= v5e's 16 MiB scoped default, <= v7x physical)
    per_step = (4 * batch_tile * T * C * 4        # x + out tiles, 2x buffered
                + 2 * 4 * C * C * 2               # wqkv + w1 bf16, 2x buffered
                + 2 * 8 * C * 4)                  # vectors
    scratch = 8 * batch_tile * T * max(T, 3 * C) * 4   # scores/p/intermediates
    vmem_limit = int(min(max(2 * (per_step + scratch), 32 << 20), 64 << 20))

    return pl.pallas_call(
        functools.partial(transformer_block_kernel, approx_recip=approx_recip),
        out_shape=jax.ShapeDtypeStruct((B, T, C), x.dtype),
        grid_spec=pltpu.PrefetchScalarGridSpec(
            num_scalar_prefetch=0,
            grid=(steps,),
            in_specs=[
                x_spec,
                vec_spec, vec_spec,          # ln1 gamma/beta
                wqkv_spec, qkv_vec_spec,     # fused Wqkv, bqkv
                vec_spec, vec_spec,          # ln2 gamma/beta
                w1_spec, vec_spec,           # W1, b1
            ],
            out_specs=pl.BlockSpec((batch_tile, T, C), lambda i: (i, 0, 0)),
        ),
        compiler_params=pltpu.CompilerParams(
            dimension_semantics=("parallel",),
            vmem_limit_bytes=vmem_limit,
        ),
        cost_estimate=pl.CostEstimate(
            flops=flops,
            transcendentals=transcendentals,
            bytes_accessed=bytes_accessed,
        ),
    )(
        x,
        prep["ln1_g"], prep["ln1_b"],
        prep["wqkv"], prep["bqkv"],
        prep["ln2_g"], prep["ln2_b"],
        prep["w1"], prep["b1"],
    )


# --------------------------------------------------------------------------
# synthetic params + pure-JAX reference
# --------------------------------------------------------------------------
def init_params(key, n_embd):
    """Deterministic synthetic parameters.

    Linear weights are stored as (in_features, out_features), i.e. already the
    transpose of torch.nn.Linear.weight, so kernels compute x @ W + b.
    """
    ks = jax.random.split(key, 8)
    scale = 0.02
    C = n_embd
    return {
        "ln1_g": jnp.ones((1, C), jnp.float32),
        "ln1_b": jnp.zeros((1, C), jnp.float32),
        "ln2_g": jnp.ones((1, C), jnp.float32),
        "ln2_b": jnp.zeros((1, C), jnp.float32),
        "wq": scale * jax.random.normal(ks[0], (C, C), jnp.float32),
        "bq": scale * jax.random.normal(ks[1], (1, C), jnp.float32),
        "wk": scale * jax.random.normal(ks[2], (C, C), jnp.float32),
        "bk": scale * jax.random.normal(ks[3], (1, C), jnp.float32),
        "wv": scale * jax.random.normal(ks[4], (C, C), jnp.float32),
        "bv": scale * jax.random.normal(ks[5], (1, C), jnp.float32),
        "w1": scale * jax.random.normal(ks[6], (C, C), jnp.float32),
        "b1": scale * jax.random.normal(ks[7], (1, C), jnp.float32),
    }


def transformer_block_ref(x, p):
    """Pure-JAX f32 reference mirroring the PyTorch forward (for verification)."""
    def ln(v, g, b):
        mu = jnp.mean(v, axis=-1, keepdims=True)
        var = jnp.mean((v - mu) ** 2, axis=-1, keepdims=True)
        return (v - mu) / jnp.sqrt(var + LN_EPS) * g + b

    B, T, C = x.shape
    h = ln(x, p["ln1_g"], p["ln1_b"])
    q = h @ p["wq"] + p["bq"]
    k = h @ p["wk"] + p["bk"]
    v = h @ p["wv"] + p["bv"]
    scores = jnp.einsum("btc,bsc->bts", q, k) * (C ** -0.5)
    mask = jnp.tril(jnp.ones((T, T), bool))
    scores = jnp.where(mask, scores, -jnp.inf)
    att = jax.nn.softmax(scores, axis=-1)
    x = x + jnp.einsum("bts,bsc->btc", att, v)
    h2 = ln(x, p["ln2_g"], p["ln2_b"])
    x = x + h2 @ p["w1"] + p["b1"]
    return x


if __name__ == "__main__":
    n_embd = 32       # C
    block_size = 8    # T
    batch = 2

    key = jax.random.PRNGKey(0)
    kx, kp = jax.random.split(key)
    x = jax.random.normal(kx, (batch, block_size, n_embd), jnp.float32)
    params = init_params(kp, n_embd)

    # one-time weight preprocessing (hoisted out of the per-call path)
    prep = jax.tree_util.tree_map(jax.block_until_ready, prepare_params(params))

    out = jax.block_until_ready(transformer_block(x, prep))

    ref = transformer_block_ref(x, params)
    assert out.shape == ref.shape
    # kernel matmuls run with bf16 MXU operands (f32 accumulation) and an
    # EUP approx reciprocal in the softmax: tolerance widened vs pure-f32 ref.
    assert jnp.allclose(out, ref, atol=1e-2, rtol=1e-2), "mismatch vs reference"

    print("KERNEL_OK")
</pallas_src>

<mosaic_0001>
module attributes {stable_mosaic.version = 11 : i64} {
  func.func @transformer_block_kernel(%arg0: i32, %arg1: memref<2x8x32xf32, #tpu.memory_space<vmem>>, %arg2: memref<1x32xf32, #tpu.memory_space<vmem>>, %arg3: memref<1x32xf32, #tpu.memory_space<vmem>>, %arg4: memref<32x96xbf16, #tpu.memory_space<vmem>>, %arg5: memref<1x96xf32, #tpu.memory_space<vmem>>, %arg6: memref<1x32xf32, #tpu.memory_space<vmem>>, %arg7: memref<1x32xf32, #tpu.memory_space<vmem>>, %arg8: memref<32x32xbf16, #tpu.memory_space<vmem>>, %arg9: memref<1x32xf32, #tpu.memory_space<vmem>>, %arg10: memref<2x8x32xf32, #tpu.memory_space<vmem>>) attributes {dimension_semantics = [#tpu.dimension_semantics<parallel>], iteration_bounds = array<i64: 1>, scalar_prefetch = 0 : i64, scratch_operands = 0 : i64, tpu.core_type = #tpu.core_type<tc>, window_params = [{transform_indices = @transform_0, window_bounds = array<i64: 2, 8, 32>}, {pipeline_mode = #tpu.pipeline_mode<synchronous>, transform_indices = @transform_1, window_bounds = array<i64: 1, 32>}, {pipeline_mode = #tpu.pipeline_mode<synchronous>, transform_indices = @transform_2, window_bounds = array<i64: 1, 32>}, {pipeline_mode = #tpu.pipeline_mode<synchronous>, transform_indices = @transform_3, window_bounds = array<i64: 32, 96>}, {pipeline_mode = #tpu.pipeline_mode<synchronous>, transform_indices = @transform_4, window_bounds = array<i64: 1, 96>}, {pipeline_mode = #tpu.pipeline_mode<synchronous>, transform_indices = @transform_5, window_bounds = array<i64: 1, 32>}, {pipeline_mode = #tpu.pipeline_mode<synchronous>, transform_indices = @transform_6, window_bounds = array<i64: 1, 32>}, {pipeline_mode = #tpu.pipeline_mode<synchronous>, transform_indices = @transform_7, window_bounds = array<i64: 32, 32>}, {pipeline_mode = #tpu.pipeline_mode<synchronous>, transform_indices = @transform_8, window_bounds = array<i64: 1, 32>}, {transform_indices = @transform_9, window_bounds = array<i64: 2, 8, 32>}]} {
    %c0 = arith.constant 0 : index
    %c0_0 = arith.constant 0 : index
    %c0_1 = arith.constant 0 : index
    %0 = vector.load %arg1[%c0, %c0_0, %c0_1] : memref<2x8x32xf32, #tpu.memory_space<vmem>>, vector<2x8x32xf32>
    %1 = vector.shape_cast %0 : vector<2x8x32xf32> to vector<16x32xf32>
    %c0_2 = arith.constant 0 : index
    %c0_3 = arith.constant 0 : index
    %2 = vector.load %arg2[%c0_2, %c0_3] : memref<1x32xf32, #tpu.memory_space<vmem>>, vector<1x32xf32>
    %c0_4 = arith.constant 0 : index
    %c0_5 = arith.constant 0 : index
    %3 = vector.load %arg3[%c0_4, %c0_5] : memref<1x32xf32, #tpu.memory_space<vmem>>, vector<1x32xf32>
    %cst = arith.constant dense<0.000000e+00> : vector<16xf32>
    %4 = vector.multi_reduction <add>, %1, %cst [1] : vector<16x32xf32> to vector<16xf32>
    %5 = vector.shape_cast %4 : vector<16xf32> to vector<16x1xf32>
    %cst_6 = arith.constant 3.200000e+01 : f32
    %6 = vector.broadcast %cst_6 : f32 to vector<16x1xf32>
    %7 = arith.divf %5, %6 : vector<16x1xf32>
    %8 = vector.broadcast %7 : vector<16x1xf32> to vector<16x32xf32>
    %9 = arith.subf %1, %8 : vector<16x32xf32>
    %10 = arith.mulf %9, %9 : vector<16x32xf32>
    %cst_7 = arith.constant dense<0.000000e+00> : vector<16xf32>
    %11 = vector.multi_reduction <add>, %10, %cst_7 [1] : vector<16x32xf32> to vector<16xf32>
    %12 = vector.shape_cast %11 : vector<16xf32> to vector<16x1xf32>
    %cst_8 = arith.constant 3.200000e+01 : f32
    %13 = vector.broadcast %cst_8 : f32 to vector<16x1xf32>
    %14 = arith.divf %12, %13 : vector<16x1xf32>
    %cst_9 = arith.constant 9.99999974E-6 : f32
    %15 = vector.broadcast %cst_9 : f32 to vector<16x1xf32>
    %16 = arith.addf %14, %15 : vector<16x1xf32>
    %17 = math.rsqrt %16 : vector<16x1xf32>
    %18 = vector.broadcast %17 : vector<16x1xf32> to vector<16x32xf32>
    %19 = arith.mulf %9, %18 : vector<16x32xf32>
    %20 = vector.broadcast %2 : vector<1x32xf32> to vector<16x32xf32>
    %21 = arith.mulf %19, %20 : vector<16x32xf32>
    %22 = vector.broadcast %3 : vector<1x32xf32> to vector<16x32xf32>
    %23 = arith.addf %21, %22 : vector<16x32xf32>
    %24 = arith.truncf %23 : vector<16x32xf32> to vector<16x32xbf16>
    %c0_10 = arith.constant 0 : index
    %c0_11 = arith.constant 0 : index
    %25 = vector.load %arg4[%c0_10, %c0_11] : memref<32x96xbf16, #tpu.memory_space<vmem>>, vector<32x96xbf16>
    %cst_12 = arith.constant dense<0.000000e+00> : vector<16x96xf32>
    %26 = tpu.matmul %24, %25, %cst_12 {dimension_numbers = #tpu.dot_dimension_numbers<[1], [0], [0], [1], [0, 0, 1, 1], [], []>} : vector<16x32xbf16>, vector<32x96xbf16>, vector<16x96xf32> -> vector<16x96xf32>
    %c0_13 = arith.constant 0 : index
    %c0_14 = arith.constant 0 : index
    %27 = vector.load %arg5[%c0_13, %c0_14] : memref<1x96xf32, #tpu.memory_space<vmem>>, vector<1x96xf32>
    %28 = vector.broadcast %27 : vector<1x96xf32> to vector<16x96xf32>
    %29 = arith.addf %26, %28 : vector<16x96xf32>
    %30 = arith.truncf %29 : vector<16x96xf32> to vector<16x96xbf16>
    %31 = vector.extract_strided_slice %30 {offsets = [0, 0], sizes = [16, 32], strides = [1, 1]} : vector<16x96xbf16> to vector<16x32xbf16>
    %32 = vector.shape_cast %31 : vector<16x32xbf16> to vector<2x8x32xbf16>
    %33 = vector.extract_strided_slice %30 {offsets = [0, 32], sizes = [16, 32], strides = [1, 1]} : vector<16x96xbf16> to vector<16x32xbf16>
    %34 = vector.shape_cast %33 : vector<16x32xbf16> to vector<2x8x32xbf16>
    %35 = vector.extract_strided_slice %30 {offsets = [0, 64], sizes = [16, 32], strides = [1, 1]} : vector<16x96xbf16> to vector<16x32xbf16>
    %36 = vector.shape_cast %35 : vector<16x32xbf16> to vector<2x8x32xbf16>
    "tpu.trace_start"() <{level = 10 : i32, message = "bqc,bkc->bqk"}> : () -> ()
    %cst_15 = arith.constant dense<0.000000e+00> : vector<2x8x8xf32>
    %37 = tpu.matmul %32, %34, %cst_15 {dimension_numbers = #tpu.dot_dimension_numbers<[2], [2], [1], [1], [0, 0, 0, 1, 1, 1], [0], [0]>} : vector<2x8x32xbf16>, vector<2x8x32xbf16>, vector<2x8x8xf32> -> vector<2x8x8xf32>
    "tpu.trace_stop"() : () -> ()
    %38 = tpu.iota {dimensions = array<i32: 0>} : vector<8x8xi32>
    %39 = tpu.iota {dimensions = array<i32: 1>} : vector<8x8xi32>
    %40 = arith.cmpi sge, %38, %39 : vector<8x8xi32>
    %41 = vector.shape_cast %40 : vector<8x8xi1> to vector<1x8x8xi1>
    %cst_16 = arith.constant -1.000000e+30 : f32
    %42 = vector.shape_cast %41 : vector<1x8x8xi1> to vector<1x8x8xi1>
    %43 = vector.broadcast %42 : vector<1x8x8xi1> to vector<2x8x8xi1>
    %44 = vector.broadcast %cst_16 : f32 to vector<2x8x8xf32>
    %45 = arith.select %43, %37, %44 : vector<2x8x8xi1>, vector<2x8x8xf32>
    %cst_17 = arith.constant dense<0xFF800000> : vector<2x8xf32>
    %46 = vector.multi_reduction <maximumf>, %45, %cst_17 [2] : vector<2x8x8xf32> to vector<2x8xf32>
    %47 = vector.shape_cast %46 : vector<2x8xf32> to vector<2x8x1xf32>
    %48 = vector.broadcast %47 : vector<2x8x1xf32> to vector<2x8x8xf32>
    %49 = arith.subf %45, %48 : vector<2x8x8xf32>
    %50 = math.exp %49 : vector<2x8x8xf32>
    %cst_18 = arith.constant dense<0.000000e+00> : vector<2x8xf32>
    %51 = vector.multi_reduction <add>, %50, %cst_18 [2] : vector<2x8x8xf32> to vector<2x8xf32>
    %52 = vector.shape_cast %51 : vector<2x8xf32> to vector<2x8x1xf32>
    %53 = tpu.reciprocal %52 {approx = true} : vector<2x8x1xf32> -> vector<2x8x1xf32>
    %54 = vector.broadcast %53 : vector<2x8x1xf32> to vector<2x8x8xf32>
    %55 = arith.mulf %50, %54 : vector<2x8x8xf32>
    %56 = arith.truncf %55 : vector<2x8x8xf32> to vector<2x8x8xbf16>
    "tpu.trace_start"() <{level = 10 : i32, message = "bqk,bkc->bqc"}> : () -> ()
    %cst_19 = arith.constant dense<0.000000e+00> : vector<2x8x32xf32>
    %57 = tpu.matmul %56, %36, %cst_19 {dimension_numbers = #tpu.dot_dimension_numbers<[2], [1], [1], [2], [0, 0, 0, 1, 1, 2], [0], [0]>} : vector<2x8x8xbf16>, vector<2x8x32xbf16>, vector<2x8x32xf32> -> vector<2x8x32xf32>
    "tpu.trace_stop"() : () -> ()
    %58 = vector.shape_cast %57 : vector<2x8x32xf32> to vector<16x32xf32>
    %59 = arith.addf %1, %58 : vector<16x32xf32>
    %c0_20 = arith.constant 0 : index
    %c0_21 = arith.constant 0 : index
    %60 = vector.load %arg6[%c0_20, %c0_21] : memref<1x32xf32, #tpu.memory_space<vmem>>, vector<1x32xf32>
    %c0_22 = arith.constant 0 : index
    %c0_23 = arith.constant 0 : index
    %61 = vector.load %arg7[%c0_22, %c0_23] : memref<1x32xf32, #tpu.memory_space<vmem>>, vector<1x32xf32>
    %cst_24 = arith.constant dense<0.000000e+00> : vector<16xf32>
    %62 = vector.multi_reduction <add>, %59, %cst_24 [1] : vector<16x32xf32> to vector<16xf32>
    %63 = vector.shape_cast %62 : vector<16xf32> to vector<16x1xf32>
    %cst_25 = arith.constant 3.200000e+01 : f32
    %64 = vector.broadcast %cst_25 : f32 to vector<16x1xf32>
    %65 = arith.divf %63, %64 : vector<16x1xf32>
    %66 = vector.broadcast %65 : vector<16x1xf32> to vector<16x32xf32>
    %67 = arith.subf %59, %66 : vector<16x32xf32>
    %68 = arith.mulf %67, %67 : vector<16x32xf32>
    %cst_26 = arith.constant dense<0.000000e+00> : vector<16xf32>
    %69 = vector.multi_reduction <add>, %68, %cst_26 [1] : vector<16x32xf32> to vector<16xf32>
    %70 = vector.shape_cast %69 : vector<16xf32> to vector<16x1xf32>
    %cst_27 = arith.constant 3.200000e+01 : f32
    %71 = vector.broadcast %cst_27 : f32 to vector<16x1xf32>
    %72 = arith.divf %70, %71 : vector<16x1xf32>
    %cst_28 = arith.constant 9.99999974E-6 : f32
    %73 = vector.broadcast %cst_28 : f32 to vector<16x1xf32>
    %74 = arith.addf %72, %73 : vector<16x1xf32>
    %75 = math.rsqrt %74 : vector<16x1xf32>
    %76 = vector.broadcast %75 : vector<16x1xf32> to vector<16x32xf32>
    %77 = arith.mulf %67, %76 : vector<16x32xf32>
    %78 = vector.broadcast %60 : vector<1x32xf32> to vector<16x32xf32>
    %79 = arith.mulf %77, %78 : vector<16x32xf32>
    %80 = vector.broadcast %61 : vector<1x32xf32> to vector<16x32xf32>
    %81 = arith.addf %79, %80 : vector<16x32xf32>
    %82 = arith.truncf %81 : vector<16x32xf32> to vector<16x32xbf16>
    %c0_29 = arith.constant 0 : index
    %c0_30 = arith.constant 0 : index
    %83 = vector.load %arg8[%c0_29, %c0_30] : memref<32x32xbf16, #tpu.memory_space<vmem>>, vector<32x32xbf16>
    %cst_31 = arith.constant dense<0.000000e+00> : vector<16x32xf32>
    %84 = tpu.matmul %82, %83, %cst_31 {dimension_numbers = #tpu.dot_dimension_numbers<[1], [0], [0], [1], [0, 0, 1, 1], [], []>} : vector<16x32xbf16>, vector<32x32xbf16>, vector<16x32xf32> -> vector<16x32xf32>
    %85 = arith.addf %59, %84 : vector<16x32xf32>
    %c0_32 = arith.constant 0 : index
    %c0_33 = arith.constant 0 : index
    %86 = vector.load %arg9[%c0_32, %c0_33] : memref<1x32xf32, #tpu.memory_space<vmem>>, vector<1x32xf32>
    %87 = vector.broadcast %86 : vector<1x32xf32> to vector<16x32xf32>
    %88 = arith.addf %85, %87 : vector<16x32xf32>
    %89 = vector.shape_cast %88 : vector<16x32xf32> to vector<2x8x32xf32>
    %c0_34 = arith.constant 0 : index
    %c0_35 = arith.constant 0 : index
    %c0_36 = arith.constant 0 : index
    %90 = vector.load %arg10[%c0_34, %c0_35, %c0_36] : memref<2x8x32xf32, #tpu.memory_space<vmem>>, vector<2x8x32xf32>
    tpu.vector_store %arg10[%c0_34, %c0_35, %c0_36], %89 {strides = array<i32>} : memref<2x8x32xf32, #tpu.memory_space<vmem>>, vector<2x8x32xf32>,
    return
  }
  func.func @transform_0(%arg0: i32) -> (i32, i32, i32) {
    %c0_i32 = arith.constant 0 : i32
    %c0_i32_0 = arith.constant 0 : i32
    %c0_i32_1 = arith.constant 0 : i32
    return %arg0, %c0_i32, %c0_i32_0 : i32, i32, i32
  }
  func.func @transform_1(%arg0: i32) -> (i32, i32) {
    %c0_i32 = arith.constant 0 : i32
    %c0_i32_0 = arith.constant 0 : i32
    %c0_i32_1 = arith.constant 0 : i32
    return %c0_i32, %c0_i32_0 : i32, i32
  }
  func.func @transform_2(%arg0: i32) -> (i32, i32) {
    %c0_i32 = arith.constant 0 : i32
    %c0_i32_0 = arith.constant 0 : i32
    %c0_i32_1 = arith.constant 0 : i32
    return %c0_i32, %c0_i32_0 : i32, i32
  }
  func.func @transform_3(%arg0: i32) -> (i32, i32) {
    %c0_i32 = arith.constant 0 : i32
    %c0_i32_0 = arith.constant 0 : i32
    %c0_i32_1 = arith.constant 0 : i32
    return %c0_i32, %c0_i32_0 : i32, i32
  }
  func.func @transform_4(%arg0: i32) -> (i32, i32) {
    %c0_i32 = arith.constant 0 : i32
    %c0_i32_0 = arith.constant 0 : i32
    %c0_i32_1 = arith.constant 0 : i32
    return %c0_i32, %c0_i32_0 : i32, i32
  }
  func.func @transform_5(%arg0: i32) -> (i32, i32) {
    %c0_i32 = arith.constant 0 : i32
    %c0_i32_0 = arith.constant 0 : i32
    %c0_i32_1 = arith.constant 0 : i32
    return %c0_i32, %c0_i32_0 : i32, i32
  }
  func.func @transform_6(%arg0: i32) -> (i32, i32) {
    %c0_i32 = arith.constant 0 : i32
    %c0_i32_0 = arith.constant 0 : i32
    %c0_i32_1 = arith.constant 0 : i32
    return %c0_i32, %c0_i32_0 : i32, i32
  }
  func.func @transform_7(%arg0: i32) -> (i32, i32) {
    %c0_i32 = arith.constant 0 : i32
    %c0_i32_0 = arith.constant 0 : i32
    %c0_i32_1 = arith.constant 0 : i32
    return %c0_i32, %c0_i32_0 : i32, i32
  }
  func.func @transform_8(%arg0: i32) -> (i32, i32) {
    %c0_i32 = arith.constant 0 : i32
    %c0_i32_0 = arith.constant 0 : i32
    %c0_i32_1 = arith.constant 0 : i32
    return %c0_i32, %c0_i32_0 : i32, i32
  }
  func.func @transform_9(%arg0: i32) -> (i32, i32, i32) {
    %c0_i32 = arith.constant 0 : i32
    %c0_i32_0 = arith.constant 0 : i32
    %c0_i32_1 = arith.constant 0 : i32
    return %arg0, %c0_i32, %c0_i32_0 : i32, i32, i32
  }
}

</mosaic_0001>

<bundles_post_ra>
// kernel: tpu_custom_call.1
= control target key start
LH: loop header
LB: loop body
LE: loop exit
PB: predicated region body
PF: predicated region fallthrough
CT: control target
= control target key end

     0   :  { %14 = vsyncpa [#allocation3], 0  ;;  %s795_s0 = inlined_call_operand.hbm [shape: f32[2,8,32], index: 0, kind: input, shape index: {}]   ;;  %s796_s1 = inlined_call_operand.hbm [shape: f32[1,32], index: 1, kind: input, shape index: {}]   ;;  %s797_s2 = inlined_call_operand.vmem [shape: f32[1,32], index: 2, kind: input, shape index: {}]   ;;  %s798_s3 = inlined_call_operand.hbm [shape: bf16[32,96], index: 3, kind: input, shape index: {}]   ;;  %s799_s4 = inlined_call_operand.vmem [shape: f32[1,96], index: 4, kind: input, shape index: {}]   ;;  %s800_s5 = inlined_call_operand.vmem [shape: f32[1,32], index: 5, kind: input, shape index: {}]   ;;  %s801_s6 = inlined_call_operand.vmem [shape: f32[1,32], index: 6, kind: input, shape index: {}]   ;;  %s802_s7 = inlined_call_operand.hbm [shape: bf16[32,32], index: 7, kind: input, shape index: {}]   ;;  %s803_s8 = inlined_call_operand.vmem [shape: f32[1,32], index: 8, kind: input, shape index: {}]   ;;  %s804_s9 = inlined_call_operand.hbm [shape: f32[2,8,32], index: 9, kind: output, shape index: {}]  }
   0x1   :  { %15 = vsyncpa [#allocation6], 0 }
   0x2   :  { %16 = vsyncpa [#allocation9], 0  ;;  %s36_s11 = sshll.u32 %s796_s1, 4  ;;  %s37_s11 = int_to_ptr.hbm [resolvable:$true] %s36_s11 }
   0x3   :  { %17 = vsyncpa [#allocation4], 0  ;;  %s638_s12 = smov [#allocation5]   ;;  %s22_s16 = sshll.u32 %s795_s0, 4  ;;  %s23_s16 = int_to_ptr.hbm [resolvable:$true] %s22_s16 }
   0x4   :  { %s38_s13 = sshll.u32 %s638_s12, 4  ;;  %s639_s17 = smov [#allocation2]   ;;  %s39_s13 = int_to_ptr.vmem [resolvable:$true] %s38_s13 }
   0x5   :  { %41 = dma.hbm_to_vmem [thread:$0]  %s37_s11, 16, %s39_s13, [#allocation6]  }
   0x6   :  { %s24_s18 = sshll.u32 %s639_s17, 4  ;;  %s640_s19 = smov 128   ;;  %s25_s18 = int_to_ptr.vmem [resolvable:$true] %s24_s18 }
   0x7   :  { %s641_s20 = smov 8   ;;  %s48_s22 = sshll.u32 %s798_s3, 4  ;;  %s49_s22 = int_to_ptr.hbm [resolvable:$true] %s48_s22 }
   0x8   :  { %30 = dma.hbm_to_vmem [thread:$0]  %s23_s16, 256, %s25_s18, [#allocation3], %s640_s19, %s640_s19, %s641_s20  }
   0x9   :  { %s642_s23 = smov [#allocation7]   ;;  %s67_s26 = sshll.u32 %s802_s7, 4  ;;  %s68_s26 = int_to_ptr.hbm [resolvable:$true] %s67_s26 }
   0xa   :  { %s50_s24 = sshll.u32 %s642_s23, 4  ;;  %s643_s27 = smov 64   ;;  %s51_s24 = int_to_ptr.vmem [resolvable:$true] %s50_s24 }
   0xb   :  { %s644_s28 = smov 4   ;;  %s645_s29 = smov [#allocation8]  }
   0xc   :  { %56 = dma.hbm_to_vmem [thread:$0]  %s49_s22, 256, %s51_s24, [#allocation6], %s643_s27, %s643_s27, %s644_s28  }
   0xd   :  { %s69_s30 = sshll.u32 %s645_s29, 4  ;;  %s70_s30 = int_to_ptr.vmem [resolvable:$true] %s69_s30 }
   0xe   :  { %75 = dma.hbm_to_vmem [thread:$0]  %s68_s26, 256, %s70_s30, [#allocation9], %s643_s27, %s643_s27, %s644_s28  }
   0xf   :  { %630 = dma.done.wait [#allocation3], 256  }
  0x10   :  { %631 = vsyncadd [#allocation3], 4294967040 }
  0x11   :  { %632 = dma.done.wait [#allocation6], 272  }
  0x12   :  { %633 = vsyncadd [#allocation6], 4294967024 }
  0x13   :  { %634 = dma.done.wait [#allocation9], 256  }
  0x14   :  { %635 = vsyncadd [#allocation9], 4294967040  ;;  %vm99_vm0 = vcmask 261120   ;;  %v718_v0 = vld [vmem:[#allocation2] sm:$0xff]  ;;  %v722_v2 = vld [vmem:[#allocation2 + $0x8] sm:$0xff]  ;;  %v646_v4 = vmov 32.0  }
  0x15   :  { %v100_v1 = vsel %vm99_vm0, %v718_v0, 0.0  ;;  %v103_v3 = vsel %vm99_vm0, %v722_v2, 0.0  ;;  %492 = vrcp.f32 %v646_v4  ;;  %v472_v21 = vld [vmem:[#allocation7 + $0x8] sm:$0xff]  ;;  %v471_v23 = vld [vmem:[#allocation7] sm:$0xff]  ;;  %v486_v42 = vld [vmem:[#allocation5] ss:$0 sm:$0xff] }
  0x16   :  { %101 = vadd.xlane.f32.xlu0 %v100_v1  ;;  %191 = vmatpush.bf16.msra.mxu0 %v472_v21  ;;  %v487_v47 = vld [vmem:[%s797_s2] ss:$0 sm:$0xff]  ;;  %s647_s12 = smov 96   ;;  %vm258_vm9 = vcmask 64512   ;;  %vm288_vm10 = vcmask 1043456   ;;  %s434_s1 = sshll.u32 %s804_s9, 4  ;;  %s435_s1 = int_to_ptr.hbm [resolvable:$true] %s434_s1 }
  0x17   :  { %v488_v52 = vld [vmem:[%s799_s4] ss:$0 sm:$0xff] }
  0x1a   :  { %192 = vmatpush.bf16.msra.mxu0 %v471_v23 }
  0x1b   :  { %v493_v5 = vpop.eup %492 }
  0x1c   :  { %v107_v6 = vmul.f32 32.0, %v493_v5  ;;  %vm111_vm1 = vweird.f32 %v493_v5 }
  0x1e   :  { %104 = vadd.xlane.f32.xlu0 %v103_v3  ;;  %v108_v7 = vsub.f32 1.0, %v107_v6 }
  0x20   :  { %v109_v8 = vmul.f32 %v493_v5, %v108_v7 }
  0x22   :  { %v110_v9 = vadd.f32 %v493_v5, %v109_v8 }
  0x24   :  { %v726_v10 = vsel %vm111_vm1, %v493_v5, %v110_v9  ;;  %v249_v5 = vlaneseq }
  0x26   :  { %v250_v6 = vshrl.u32 %v249_v5, 7  ;;  %v252_v7 = vand.u32 127, %v249_v5 }
  0x28   :  { %vm253_vm8 = vcmp.ge.s32.totalorder %v250_v6, %v252_v7 }
  0x89   :  { %v102_v11 = vpop.xlane.xlu0 %101 }
  0x8a   :  { %v113_v12 = vmul.f32 %v726_v10, %v102_v11 }
  0x8c   :  { %v115_v13 = vsub.f32 %v718_v0, %v113_v12 }
  0x8e   :  { %v117_v14 = vmul.f32 %v115_v13, %v115_v13 }
  0x90   :  { %v119_v15 = vsel %vm99_vm0, %v117_v14, 0.0 }
  0x91   :  { %120 = vadd.xlane.f32.xlu1 %v119_v15  ;;  %v105_v16 = vpop.xlane.xlu0 %104 }
  0x92   :  { %v114_v17 = vmul.f32 %v726_v10, %v105_v16 }
  0x94   :  { %v116_v18 = vsub.f32 %v722_v2, %v114_v17 }
  0x96   :  { %v118_v19 = vmul.f32 %v116_v18, %v116_v18 }
  0x98   :  { %v122_v20 = vsel %vm99_vm0, %v118_v19, 0.0 }
  0x99   :  { %123 = vadd.xlane.f32.xlu1 %v122_v20 }
 0x104   :  { %v121_v22 = vpop.xlane.xlu1 %120 }
 0x105   :  { %v125_v24 = vmul.f32 %v121_v22, %v726_v10 }
 0x107   :  { %v127_v25 = vadd.f32 1e-05, %v125_v24 }
 0x109   :  { %494 = vrsqrt.f32 %v127_v25  ;;  %vm135_vm3 = vweird.f32 %v127_v25 }
 0x10c   :  { %v124_v26 = vpop.xlane.xlu1 %123 }
 0x10d   :  { %v126_v27 = vmul.f32 %v124_v26, %v726_v10 }
 0x10f   :  { %v495_v28 = vpop.eup %494  ;;  %v128_v29 = vadd.f32 1e-05, %v126_v27 }
 0x110   :  { %v130_v30 = vmul.f32 %v495_v28, %v127_v25  ;;  %vm136_vm2 = vweird.f32 %v495_v28 }
 0x111   :  { %496 = vrsqrt.f32 %v128_v29  ;;  %vm137_vm4 = vmor %vm135_vm3, %vm136_vm2  ;;  %vm145_vm6 = vweird.f32 %v128_v29 }
 0x112   :  { %v131_v31 = vmul.f32 %v495_v28, %v130_v30 }
 0x114   :  { %v132_v32 = vmul.f32 0.5, %v131_v31 }
 0x116   :  { %v133_v33 = vsub.f32 1.5, %v132_v32 }
 0x117   :  { %v497_v34 = vpop.eup %496 }
 0x118   :  { %v134_v35 = vmul.f32 %v495_v28, %v133_v33  ;;  %v140_v36 = vmul.f32 %v497_v34, %v128_v29  ;;  %vm146_vm5 = vweird.f32 %v497_v34 }
 0x119   :  { %vm147_vm7 = vmor %vm145_vm6, %vm146_vm5 }
 0x11a   :  { %v141_v37 = vmul.f32 %v497_v34, %v140_v36  ;;  %v138_v38 = vsel %vm137_vm4, %v495_v28, %v134_v35 }
 0x11b   :  { %v149_v41 = vmul.f32 %v138_v38, %v115_v13 }
 0x11c   :  { %v142_v39 = vmul.f32 0.5, %v141_v37 }
 0x11d   :  { %v154_v46 = vmul.f32 %v486_v42, %v149_v41 }
 0x11e   :  { %v143_v40 = vsub.f32 1.5, %v142_v39 }
 0x11f   :  { %v159_v49 = vadd.f32 %v487_v47, %v154_v46 }
 0x120   :  { %v144_v43 = vmul.f32 %v497_v34, %v143_v40 }
 0x122   :  { %v148_v44 = vsel %vm147_vm7, %v497_v34, %v144_v43 }
 0x123   :  { %v150_v45 = vmul.f32 %v148_v44, %v116_v18 }
 0x125   :  { %v155_v48 = vmul.f32 %v486_v42, %v150_v45 }
 0x127   :  { %v160_v50 = vadd.f32 %v487_v47, %v155_v48 }
 0x129   :  { %v161_v51 = vpack.c.bf16 %v160_v50, %v159_v49 }
 0x12b   :  { %457 = vmatmul.msk.bf16.vlgmr.msra.gmra.mxu0 %vm99_vm0, %v161_v51 }
 0x1a8   :  { %v194_v53 = vpop.f32.mrf.mxu0 }
 0x1a9   :  { %v195_v54 = vadd.f32 %v488_v52, %v194_v53 }
 0x1ab   :  { %v199_v55 = vpack.c.bf16 %v195_v54, %v195_v54 }
 0x1ad   :  { %v202_v56 = vunpack.c.l.b16 %v199_v55 }
 0x1af   :  { %v203_v57 = vpack.c.b16 %v202_v56, %v202_v56 }
 0x1b0   :  { %v196_v58 = vpop.f32.mrf.mxu0 }
 0x1b1   :  { %v197_v59 = vadd.f32 %v488_v52, %v196_v58  ;;  %204 = vrot.lane.b32.xlu2 %v203_v57, %s647_s12  ;;  %v474_v58 = vld [vmem:[#allocation8 + $0x8] sm:$0xff] }
 0x1b2   :  { %410 = vmatpush.bf16.msrb.mxu0 %v474_v58 }
 0x1b3   :  { %v200_v60 = vpack.c.bf16 %v197_v59, %v197_v59  ;;  %v473_v59 = vld [vmem:[#allocation8] sm:$0xff] }
 0x1b5   :  { %v226_v61 = vunpack.c.l.b16 %v200_v60 }
 0x1b6   :  { %411 = vmatpush.bf16.msrb.mxu0 %v473_v59 }
 0x1b7   :  { %v227_v62 = vpack.c.b16 %v226_v61, %v226_v61 }
 0x1b9   :  { %228 = vrot.lane.b32.xlu2 %v227_v62, %s647_s12 }
 0x20b   :  { %v205_v63 = vpop.permute.xlu2 %204 }
 0x20c   :  { %v210_v1 = vsel %vm99_vm0, %v205_v63, 0 }
 0x20d   :  { %219 = vmatpush.bf16.xpose.msra.mxu1 %v210_v1 }
 0x213   :  { %v229_v3 = vpop.permute.xlu2 %228 }
 0x214   :  { %458 = vmatmul.msk.bf16.vlgmr.msra.gmra.mxu1 %vm99_vm0, %v199_v55  ;;  %v234_v4 = vsel %vm99_vm0, %v229_v3, 0 }
 0x215   :  { %243 = vmatpush.bf16.xpose.msra.mxu2 %v234_v4 }
 0x21c   :  { %459 = vmatmul.msk.bf16.vlgmr.msra.gmra.mxu2 %vm99_vm0, %v200_v60 }
 0x291   :  { %v221_v8 = vpop.f32.mrf.mxu1 }
 0x292   :  { %v256_v9 = vsel %vm253_vm8, %v221_v8, -1e+30 }
 0x293   :  { %v259_v11 = vsel %vm258_vm9, %v256_v9, -inf }
 0x294   :  { %260 = vmax.xlane.f32.xlu0 %v259_v11 }
 0x299   :  { %v223_v12 = vpop.f32.mrf.mxu1 }
 0x29f   :  { %v245_v13 = vpop.f32.mrf.mxu2 }
 0x2a0   :  { %v257_v14 = vsel %vm253_vm8, %v245_v13, -1e+30 }
 0x2a1   :  { %v262_v15 = vsel %vm258_vm9, %v257_v14, -inf }
 0x2a2   :  { %263 = vmax.xlane.f32.xlu1 %v262_v15 }
 0x2a7   :  { %v247_v16 = vpop.f32.mrf.mxu2 }
 0x2a8   :  { %283 = vrot.lane.b32.xlu0 %v203_v57, %s643_s27 }
 0x307   :  { %v261_v17 = vpop.xlane.xlu0 %260 }
 0x308   :  { %v265_v18 = vsub.f32 %v256_v9, %v261_v17 }
 0x30a   :  { %v267_v19 = vmul.f32 1.442695, %v265_v18 }
 0x30c   :  { %498 = vpow2.f32 %v267_v19  ;;  %v490_v19 = vld [vmem:[%s801_s6] ss:$0 sm:$0xff] }
 0x312   :  { %v499_v20 = vpop.eup %498 }
 0x313   :  { %v271_v21 = vsel %vm258_vm9, %v499_v20, 0.0 }
 0x314   :  { %272 = vadd.xlane.f32.xlu2 %v271_v21 }
 0x315   :  { %v264_v22 = vpop.xlane.xlu1 %263 }
 0x316   :  { %v266_v23 = vsub.f32 %v257_v14, %v264_v22 }
 0x318   :  { %v269_v24 = vmul.f32 1.442695, %v266_v23 }
 0x31a   :  { %500 = vpow2.f32 %v269_v24  ;;  %v284_v25 = vpop.permute.xlu0 %283  ;;  %v491_v24 = vld [vmem:[%s803_s8] ss:$0 sm:$0xff] }
 0x31b   :  { %v290_v26 = vsel %vm288_vm10, %v284_v25, 0 }
 0x31c   :  { %299 = vmatpush.bf16.msra.mxu3 %v290_v26 }
 0x320   :  { %v501_v27 = vpop.eup %500 }
 0x321   :  { %v274_v28 = vsel %vm258_vm9, %v501_v27, 0.0 }
 0x322   :  { %275 = vadd.xlane.f32.xlu1 %v274_v28 }
 0x33b   :  { %305 = vrot.lane.b32.xlu1 %v227_v62, %s643_s27 }
 0x387   :  { %v273_v29 = vpop.xlane.xlu2 %272 }
 0x388   :  { %502 = vrcp.f32 %v273_v29 }
 0x38e   :  { %v503_v30 = vpop.eup %502 }
 0x38f   :  { %v279_v31 = vmul.f32 %v503_v30, %v499_v20 }
 0x391   :  { %v281_v32 = vpack.c.bf16 %v279_v31, %v279_v31 }
 0x393   :  { %460 = vmatmul.msk.bf16.vlgmr.msra.gmra.mxu3 %vm258_vm9, %v281_v32 }
 0x395   :  { %v276_v33 = vpop.xlane.xlu1 %275 }
 0x396   :  { %504 = vrcp.f32 %v276_v33 }
 0x39c   :  { %v505_v34 = vpop.eup %504 }
 0x39d   :  { %v280_v35 = vmul.f32 %v505_v34, %v501_v27 }
 0x39f   :  { %v282_v38 = vpack.c.bf16 %v280_v35, %v280_v35 }
 0x3ad   :  { %v306_v36 = vpop.permute.xlu1 %305 }
 0x3ae   :  { %v311_v37 = vsel %vm288_vm10, %v306_v36, 0 }
 0x3af   :  { %320 = vmatpush.bf16.msrb.mxu3 %v311_v37 }
 0x3b2   :  { %461 = vmatmul.msk.bf16.vlgmr.msrb.gmra.mxu3 %vm258_vm9, %v282_v38 }
 0x416   :  { %v301_v39 = vpop.f32.mrf.mxu3 }
 0x417   :  { %v758_v40 = vadd.f32 %v301_v39, %v718_v0 }
 0x419   :  { %v330_v41 = vsel %vm99_vm0, %v758_v40, 0.0 }
 0x41a   :  { %331 = vadd.xlane.f32.xlu0 %v330_v41 }
 0x41e   :  { %v303_v42 = vpop.f32.mrf.mxu3 }
 0x435   :  { %v322_v43 = vpop.f32.mrf.mxu3 }
 0x436   :  { %v763_v44 = vadd.f32 %v322_v43, %v722_v2 }
 0x438   :  { %v333_v45 = vsel %vm99_vm0, %v763_v44, 0.0 }
 0x439   :  { %334 = vadd.xlane.f32.xlu1 %v333_v45 }
 0x43d   :  { %v324_v46 = vpop.f32.mrf.mxu3 }
 0x48d   :  { %v332_v47 = vpop.xlane.xlu0 %331 }
 0x48e   :  { %v336_v48 = vmul.f32 %v332_v47, %v726_v10 }
 0x490   :  { %v338_v0 = vsub.f32 %v758_v40, %v336_v48 }
 0x492   :  { %v340_v49 = vmul.f32 %v338_v0, %v338_v0 }
 0x494   :  { %v342_v50 = vsel %vm99_vm0, %v340_v49, 0.0 }
 0x495   :  { %343 = vadd.xlane.f32.xlu2 %v342_v50 }
 0x4ac   :  { %v335_v51 = vpop.xlane.xlu1 %334 }
 0x4ad   :  { %v337_v52 = vmul.f32 %v335_v51, %v726_v10 }
 0x4af   :  { %v339_v2 = vsub.f32 %v763_v44, %v337_v52 }
 0x4b1   :  { %v341_v53 = vmul.f32 %v339_v2, %v339_v2 }
 0x4b3   :  { %v345_v54 = vsel %vm99_vm0, %v341_v53, 0.0 }
 0x4b4   :  { %346 = vadd.xlane.f32.xlu2 %v345_v54 }
 0x508   :  { %v344_v55 = vpop.xlane.xlu2 %343 }
 0x509   :  { %v348_v56 = vmul.f32 %v344_v55, %v726_v10 }
 0x50b   :  { %v350_v57 = vadd.f32 1e-05, %v348_v56 }
 0x50d   :  { %506 = vrsqrt.f32 %v350_v57  ;;  %vm358_vm12 = vweird.f32 %v350_v57 }
 0x513   :  { %v507_v60 = vpop.eup %506 }
 0x514   :  { %v353_v61 = vmul.f32 %v507_v60, %v350_v57  ;;  %vm359_vm11 = vweird.f32 %v507_v60 }
 0x515   :  { %vm360_vm13 = vmor %vm358_vm12, %vm359_vm11 }
 0x516   :  { %v354_v62 = vmul.f32 %v507_v60, %v353_v61 }
 0x518   :  { %v355_v4 = vmul.f32 0.5, %v354_v62 }
 0x51a   :  { %v356_v5 = vsub.f32 1.5, %v355_v4 }
 0x51c   :  { %v357_v7 = vmul.f32 %v507_v60, %v356_v5 }
 0x51e   :  { %v361_v11 = vsel %vm360_vm13, %v507_v60, %v357_v7 }
 0x51f   :  { %v372_v14 = vmul.f32 %v361_v11, %v338_v0 }
 0x527   :  { %v347_v63 = vpop.xlane.xlu2 %346 }
 0x528   :  { %v349_v1 = vmul.f32 %v347_v63, %v726_v10  ;;  %v489_v10 = vld [vmem:[%s800_s5] ss:$0 sm:$0xff]  ;;  %s648_s5 = smov [#allocation10]  }
 0x529   :  { %v377_v18 = vmul.f32 %v489_v10, %v372_v14  ;;  %s432_s17 = sshll.u32 %s648_s5, 4  ;;  %s433_s17 = int_to_ptr.vmem [resolvable:$true] %s432_s17 }
 0x52a   :  { %v351_v3 = vadd.f32 1e-05, %v349_v1 }
 0x52b   :  { %v382_v21 = vadd.f32 %v490_v19, %v377_v18 }
 0x52c   :  { %508 = vrsqrt.f32 %v351_v3  ;;  %vm368_vm15 = vweird.f32 %v351_v3 }
 0x532   :  { %v509_v6 = vpop.eup %508 }
 0x533   :  { %v363_v8 = vmul.f32 %v509_v6, %v351_v3  ;;  %vm369_vm14 = vweird.f32 %v509_v6 }
 0x534   :  { %vm370_vm1 = vmor %vm368_vm15, %vm369_vm14 }
 0x535   :  { %v364_v9 = vmul.f32 %v509_v6, %v363_v8 }
 0x537   :  { %v365_v12 = vmul.f32 0.5, %v364_v9 }
 0x539   :  { %v366_v13 = vsub.f32 1.5, %v365_v12 }
 0x53b   :  { %v367_v15 = vmul.f32 %v509_v6, %v366_v13 }
 0x53d   :  { %v371_v16 = vsel %vm370_vm1, %v509_v6, %v367_v15 }
 0x53e   :  { %v373_v17 = vmul.f32 %v371_v16, %v339_v2 }
 0x540   :  { %v378_v20 = vmul.f32 %v489_v10, %v373_v17 }
 0x542   :  { %v383_v22 = vadd.f32 %v490_v19, %v378_v20 }
 0x544   :  { %v384_v23 = vpack.c.bf16 %v383_v22, %v382_v21 }
 0x546   :  { %470 = vmatmul.msk.bf16.vlgmr.msrb.gmra.mxu0 %vm99_vm0, %v384_v23 }
 0x5c3   :  { %v413_v25 = vpop.f32.mrf.mxu0 }
 0x5c4   :  { %v418_v26 = vadd.f32 %v413_v25, %v758_v40 }
 0x5c6   :  { %v424_v27 = vadd.f32 %v491_v24, %v418_v26 }
 0x5c8   :  { %426 = vst.msk [vmem:[#allocation10] sm:$0xff] %vm99_vm0, %v424_v27 }
 0x5cb   :  { %v415_v28 = vpop.f32.mrf.mxu0 }
 0x5cc   :  { %v419_v29 = vadd.f32 %v415_v28, %v763_v44 }
 0x5ce   :  { %v425_v30 = vadd.f32 %v491_v24, %v419_v29 }
 0x5d0   :  { %427 = vst.msk [vmem:[#allocation10 + $0x8] sm:$0xff] %vm99_vm0, %v425_v30 }
 0x5d1   :  { %440 = dma.vmem_to_hbm [thread:$0]  %s433_s17, 256, %s435_s1, [#allocation4], %s640_s19, %s640_s19, %s641_s20  }
 0x5d2   :  { %636 = dma.done.wait [#allocation4], 256  }
 0x5d3   :  { %637 = vsyncadd [#allocation4], 4294967040 }
 0x5d4   :  { %445 = vsyncpa [#allocation3], 1 }
 0x5d5   :  { %446 = vsyncpa [#allocation6], 1 }
 0x5d6   :  { %447 = vsyncpa [#allocation9], 1 }
 0x5d7   :  { %448 = vsyncpa [#allocation4], 1 }

</bundles_post_ra>
